<compile_context>
chip_gen: v6e
topology: v6e:2x2x1
jax: 0.10.0
libtpu: 0.0.40
codegen_flags: <defaults>
</compile_context>

<pallas_src>
import functools

import jax
import jax.numpy as jnp
from jax.experimental import pallas as pl
from jax.experimental.pallas import tpu as pltpu

N_CLASSES = 5  # fixed by the module (5-way classification)


def _round_up(n, m):
    return ((n + m - 1) // m) * m


# ----------------------------------------------------------------------------
# Fused kernel (one batch tile per grid step).  All compute is "transposed":
# batch lives on the lane axis, (class, model) rows on sublanes.
#
#   xT_ref  : (F, TILE_B)        f32  input features, transposed (lane-dense)
#   fsw_ref : (5*Mp, F)          f32  stacked first-stage weights
#                                     row c*Mp + m  <-  model m, class c
#   fsb_ref : (5*Mp, 1)          f32  stacked first-stage biases
#   whw_ref : (5, 5*Mp)          f32  collapsed head weight (zero cols for
#                                     padded models):  whw[j, c*Mp+m] =
#                                     (w1 @ w2)[m*5 + c, j]
#   whb_ref : (5, 1)             f32  collapsed head bias  (b1 @ w2 + b2).T
#   o_ref   : (5, TILE_B)        f32  softmax output, transposed (lane-dense)
# ----------------------------------------------------------------------------
def _ensemble_kernel(xT_ref, fsw_ref, fsb_ref, whw_ref, whb_ref, o_ref, *, mp):
    xT = xT_ref[...]                                            # (F, TILE_B)

    # ---- fused first stage: ONE matmul for all 5*Mp (class, model) rows ----
    logits = jnp.dot(fsw_ref[...], xT,
                     preferred_element_type=jnp.float32) + fsb_ref[...]
    #                                                            (5*Mp, TILE_B)

    # grouped (per-model) softmax over the 5 class slices; slices are static
    # and sublane-aligned (mp % 8 == 0).  Numerically stable via grouped max.
    gmax = logits[0:mp, :]
    for c in range(1, N_CLASSES):
        gmax = jnp.maximum(gmax, logits[c * mp:(c + 1) * mp, :])
    es = [jnp.exp(logits[c * mp:(c + 1) * mp, :] - gmax)        # EUP
          for c in range(N_CLASSES)]
    denom = es[0]
    for c in range(1, N_CLASSES):
        denom = denom + es[c]
    inv = pl.reciprocal(denom, approx=True)                     # EUP slot
    probs = jnp.concatenate([e * inv for e in es], axis=0)      # (5*Mp, TILE_B)

    # ---- collapsed head: ONE matmul  (5, 5*Mp) @ (5*Mp, TILE_B) -------------
    out_logits = jnp.dot(whw_ref[...], probs,
                         preferred_element_type=jnp.float32) + whb_ref[...]
    #                                                            (5, TILE_B)

    # ---- final softmax over output classes (sublane axis), exact divide ----
    omax = jnp.max(out_logits, axis=0, keepdims=True)
    oexp = jnp.exp(out_logits - omax)
    osum = jnp.sum(oexp, axis=0, keepdims=True)
    o_ref[...] = (oexp / osum).astype(o_ref.dtype)


# ----------------------------------------------------------------------------
# Wrapper: parameter repacking (done once, tiny) + tiled pallas_call
# ----------------------------------------------------------------------------
def _pack_kernel_params(params):
    fs_w = params["fs_w"]                                  # (M, F, 5)
    fs_b = params["fs_b"]                                  # (M, 5)
    M, F, C = fs_w.shape
    assert C == N_CLASSES
    mp = _round_up(M, 8)                                   # sublane-aligned models

    # stacked first-stage params: row c*mp + m  <-  model m, class c
    fs_w_p = jnp.pad(fs_w, ((0, mp - M), (0, 0), (0, 0)))  # (mp, F, 5)
    fs_b_p = jnp.pad(fs_b, ((0, mp - M), (0, 0)))          # (mp, 5)
    fsw = jnp.transpose(fs_w_p, (2, 0, 1)).reshape(C * mp, F)
    fsb = jnp.transpose(fs_b_p, (1, 0)).reshape(C * mp, 1)

    # collapse the two bias-only Linears:  W = w1 @ w2, b = b1 @ w2 + b2
    W = params["w1"] @ params["w2"]                        # (5*M, 5), row = m*5 + c
    b = params["b1"] @ params["w2"] + params["b2"]         # (1, 5)

    # pack head weight as (5, 5*mp), zero columns for padded models
    W3 = jnp.pad(W.reshape(M, C, C), ((0, mp - M), (0, 0), (0, 0)))  # [m, c, j]
    whw = jnp.transpose(W3, (2, 1, 0)).reshape(C, C * mp)  # [j, c*mp + m]
    whb = jnp.reshape(b, (C, 1))
    return fsw, fsb, whw, whb, mp


def ensemble_forward(x, params, tile_b=1024):
    B, F = x.shape
    fsw, fsb, whw, whb, mp = _pack_kernel_params(params)

    # Batch tile: multiple of 128 (lane-dense output).  Big tiles amortize the
    # ~0.35us per-grid-step overhead; cap so there are >= 2 grid steps when
    # possible (lets v7x shard the "parallel" axis across its 2 TensorCores).
    b128 = _round_up(B, 128)
    tile_b = min(int(tile_b), b128)
    if b128 >= 256:
        tile_b = min(tile_b, _round_up(b128 // 2, 128))
    tile_b = max(128, (tile_b // 128) * 128)
    Bp = _round_up(B, tile_b)
    grid = (Bp // tile_b,)

    # Present x transposed (F, B) + pad tail: a single fused XLA copy.  The
    # (F, tile_b) blocks are lane-dense and ~8x smaller in VMEM than (tile_b, F).
    # TODO(synk): if upstream can produce x already laid out (F, B), drop this copy.
    xT = jnp.pad(jnp.transpose(x), ((0, 0), (0, Bp - B)))

    # advisory cost hint (overhead/mem-bound regime; MXU utilization is tiny)
    flops = int(2 * Bp * (N_CLASSES * mp * F + N_CLASSES * N_CLASSES * mp))
    transcendentals = int(Bp * (N_CLASSES * mp + N_CLASSES))
    bytes_accessed = int(
        4 * (Bp * F + N_CLASSES * Bp)
        + 4 * (fsw.size + fsb.size + whw.size + whb.size)
    )

    out_t = pl.pallas_call(
        functools.partial(_ensemble_kernel, mp=mp),
        out_shape=jax.ShapeDtypeStruct((N_CLASSES, Bp), jnp.float32),
        grid_spec=pltpu.PrefetchScalarGridSpec(
            num_scalar_prefetch=0,
            grid=grid,
            in_specs=[
                pl.BlockSpec((F, tile_b), lambda i: (0, i)),   # x.T tiled on batch
                pl.BlockSpec(fsw.shape, lambda i: (0, 0)),     # weights pinned
                pl.BlockSpec(fsb.shape, lambda i: (0, 0)),
                pl.BlockSpec(whw.shape, lambda i: (0, 0)),
                pl.BlockSpec(whb.shape, lambda i: (0, 0)),
            ],
            out_specs=pl.BlockSpec((N_CLASSES, tile_b), lambda i: (0, i)),
        ),
        compiler_params=pltpu.CompilerParams(
            dimension_semantics=("parallel",),       # 2 TCs on v7x; no-op v5e/v6e
            vmem_limit_bytes=32 * 1024 * 1024,       # >v5e default, safe on v7x
        ),
        cost_estimate=pl.CostEstimate(
            flops=flops,
            transcendentals=transcendentals,
            bytes_accessed=bytes_accessed,
        ),
    )(xT, fsw, fsb, whw, whb)

    # layout plumbing only: present (B, 5) like the PyTorch module
    return out_t.T[:B]


# ----------------------------------------------------------------------------
# Pure-JAX reference (original two-Linear formulation) and parameter init
# ----------------------------------------------------------------------------
def reference_forward(x, params):
    logits1 = jnp.einsum("bf,mfc->bmc", x, params["fs_w"]) + params["fs_b"][None]
    probs1 = jax.nn.softmax(logits1, axis=-1)              # (B, M, 5)
    feats = probs1.reshape(x.shape[0], -1)                 # (B, 5*M), torch cat order
    h = feats @ params["w1"] + params["b1"]                # Linear(5*M, 20)
    logits = h @ params["w2"] + params["b2"]               # Linear(20, 5)
    return jax.nn.softmax(logits, axis=1)


def init_params(key, nb_models, in_features):
    k = jax.random.split(key, 6)
    d_in = N_CLASSES * nb_models
    return {
        # simulated first-stage models (net_classification not available)
        "fs_w": jax.random.normal(k[0], (nb_models, in_features, N_CLASSES), jnp.float32) * 0.1,
        "fs_b": jax.random.normal(k[1], (nb_models, N_CLASSES), jnp.float32) * 0.1,
        # nn.Linear(5*nb_models, 20)
        "w1": jax.random.normal(k[2], (d_in, 20), jnp.float32) * (1.0 / jnp.sqrt(d_in)),
        "b1": jax.random.normal(k[3], (1, 20), jnp.float32) * 0.01,
        # nn.Linear(20, 5)
        "w2": jax.random.normal(k[4], (20, N_CLASSES), jnp.float32) * (1.0 / jnp.sqrt(20.0)),
        "b2": jax.random.normal(k[5], (1, N_CLASSES), jnp.float32) * 0.01,
    }


if __name__ == "__main__":
    B = 200          # non-multiple of 128: exercises padding + a 2-step grid
    F = 16           # raw feature dim fed to the first-stage models
    NB_MODELS = 20   # default nb_models in ensemble.__init__

    key = jax.random.PRNGKey(0)
    kx, kp = jax.random.split(key)
    x = jax.random.normal(kx, (B, F), jnp.float32)
    params = init_params(kp, NB_MODELS, F)

    out = ensemble_forward(x, params)
    out = jax.block_until_ready(out)

    # sanity: shape (B, 5), rows sum to ~1 (softmax)
    assert out.shape == (B, N_CLASSES)
    assert jnp.allclose(jnp.sum(out, axis=1), 1.0, atol=1e-3)

    # tolerance-asserted reference check (collapsed linears + approx reciprocal
    # in the grouped softmax change f32 rounding slightly vs. the reference)
    ref = reference_forward(x, params)
    assert jnp.allclose(out, ref, atol=5e-3, rtol=5e-3), float(
        jnp.max(jnp.abs(out - ref))
    )

    print("KERNEL_OK")
</pallas_src>

<mosaic_0001>
module attributes {stable_mosaic.version = 11 : i64} {
  func.func @_ensemble_kernel(%arg0: i32, %arg1: memref<16x128xf32, #tpu.memory_space<vmem>>, %arg2: memref<120x16xf32, #tpu.memory_space<vmem>>, %arg3: memref<120x1xf32, #tpu.memory_space<vmem>>, %arg4: memref<5x120xf32, #tpu.memory_space<vmem>>, %arg5: memref<5x1xf32, #tpu.memory_space<vmem>>, %arg6: memref<5x128xf32, #tpu.memory_space<vmem>>) attributes {dimension_semantics = [#tpu.dimension_semantics<parallel>], iteration_bounds = array<i64: 2>, scalar_prefetch = 0 : i64, scratch_operands = 0 : i64, tpu.core_type = #tpu.core_type<tc>, window_params = [{transform_indices = @transform_0, window_bounds = array<i64: 16, 128>}, {pipeline_mode = #tpu.pipeline_mode<synchronous>, transform_indices = @transform_1, window_bounds = array<i64: 120, 16>}, {pipeline_mode = #tpu.pipeline_mode<synchronous>, transform_indices = @transform_2, window_bounds = array<i64: 120, 1>}, {pipeline_mode = #tpu.pipeline_mode<synchronous>, transform_indices = @transform_3, window_bounds = array<i64: 5, 120>}, {pipeline_mode = #tpu.pipeline_mode<synchronous>, transform_indices = @transform_4, window_bounds = array<i64: 5, 1>}, {transform_indices = @transform_5, window_bounds = array<i64: 5, 128>}]} {
    %c0 = arith.constant 0 : index
    %c0_0 = arith.constant 0 : index
    %0 = vector.load %arg1[%c0, %c0_0] : memref<16x128xf32, #tpu.memory_space<vmem>>, vector<16x128xf32>
    %c0_1 = arith.constant 0 : index
    %c0_2 = arith.constant 0 : index
    %1 = vector.load %arg2[%c0_1, %c0_2] : memref<120x16xf32, #tpu.memory_space<vmem>>, vector<120x16xf32>
    %cst = arith.constant dense<0.000000e+00> : vector<120x128xf32>
    %2 = tpu.matmul %1, %0, %cst {dimension_numbers = #tpu.dot_dimension_numbers<[1], [0], [0], [1], [0, 0, 1, 1], [], []>} : vector<120x16xf32>, vector<16x128xf32>, vector<120x128xf32> -> vector<120x128xf32>
    %c0_3 = arith.constant 0 : index
    %c0_4 = arith.constant 0 : index
    %3 = vector.load %arg3[%c0_3, %c0_4] : memref<120x1xf32, #tpu.memory_space<vmem>>, vector<120x1xf32>
    %4 = vector.broadcast %3 : vector<120x1xf32> to vector<120x128xf32>
    %5 = arith.addf %2, %4 : vector<120x128xf32>
    %6 = vector.extract_strided_slice %5 {offsets = [0, 0], sizes = [24, 128], strides = [1, 1]} : vector<120x128xf32> to vector<24x128xf32>
    %7 = vector.extract_strided_slice %5 {offsets = [24, 0], sizes = [24, 128], strides = [1, 1]} : vector<120x128xf32> to vector<24x128xf32>
    %8 = arith.maximumf %6, %7 : vector<24x128xf32>
    %9 = vector.extract_strided_slice %5 {offsets = [48, 0], sizes = [24, 128], strides = [1, 1]} : vector<120x128xf32> to vector<24x128xf32>
    %10 = arith.maximumf %8, %9 : vector<24x128xf32>
    %11 = vector.extract_strided_slice %5 {offsets = [72, 0], sizes = [24, 128], strides = [1, 1]} : vector<120x128xf32> to vector<24x128xf32>
    %12 = arith.maximumf %10, %11 : vector<24x128xf32>
    %13 = vector.extract_strided_slice %5 {offsets = [96, 0], sizes = [24, 128], strides = [1, 1]} : vector<120x128xf32> to vector<24x128xf32>
    %14 = arith.maximumf %12, %13 : vector<24x128xf32>
    %15 = vector.extract_strided_slice %5 {offsets = [0, 0], sizes = [24, 128], strides = [1, 1]} : vector<120x128xf32> to vector<24x128xf32>
    %16 = arith.subf %15, %14 : vector<24x128xf32>
    %17 = math.exp %16 : vector<24x128xf32>
    %18 = vector.extract_strided_slice %5 {offsets = [24, 0], sizes = [24, 128], strides = [1, 1]} : vector<120x128xf32> to vector<24x128xf32>
    %19 = arith.subf %18, %14 : vector<24x128xf32>
    %20 = math.exp %19 : vector<24x128xf32>
    %21 = vector.extract_strided_slice %5 {offsets = [48, 0], sizes = [24, 128], strides = [1, 1]} : vector<120x128xf32> to vector<24x128xf32>
    %22 = arith.subf %21, %14 : vector<24x128xf32>
    %23 = math.exp %22 : vector<24x128xf32>
    %24 = vector.extract_strided_slice %5 {offsets = [72, 0], sizes = [24, 128], strides = [1, 1]} : vector<120x128xf32> to vector<24x128xf32>
    %25 = arith.subf %24, %14 : vector<24x128xf32>
    %26 = math.exp %25 : vector<24x128xf32>
    %27 = vector.extract_strided_slice %5 {offsets = [96, 0], sizes = [24, 128], strides = [1, 1]} : vector<120x128xf32> to vector<24x128xf32>
    %28 = arith.subf %27, %14 : vector<24x128xf32>
    %29 = math.exp %28 : vector<24x128xf32>
    %30 = arith.addf %17, %20 : vector<24x128xf32>
    %31 = arith.addf %30, %23 : vector<24x128xf32>
    %32 = arith.addf %31, %26 : vector<24x128xf32>
    %33 = arith.addf %32, %29 : vector<24x128xf32>
    %34 = tpu.reciprocal %33 {approx = true} : vector<24x128xf32> -> vector<24x128xf32>
    %35 = arith.mulf %17, %34 : vector<24x128xf32>
    %36 = arith.mulf %20, %34 : vector<24x128xf32>
    %37 = arith.mulf %23, %34 : vector<24x128xf32>
    %38 = arith.mulf %26, %34 : vector<24x128xf32>
    %39 = arith.mulf %29, %34 : vector<24x128xf32>
    %40 = tpu.concatenate %35, %36, %37, %38, %39 in 0 : vector<24x128xf32>, vector<24x128xf32>, vector<24x128xf32>, vector<24x128xf32>, vector<24x128xf32> -> vector<120x128xf32>
    %c0_5 = arith.constant 0 : index
    %c0_6 = arith.constant 0 : index
    %41 = vector.load %arg4[%c0_5, %c0_6] : memref<5x120xf32, #tpu.memory_space<vmem>>, vector<5x120xf32>
    %cst_7 = arith.constant dense<0.000000e+00> : vector<5x128xf32>
    %42 = tpu.matmul %41, %40, %cst_7 {dimension_numbers = #tpu.dot_dimension_numbers<[1], [0], [0], [1], [0, 0, 1, 1], [], []>} : vector<5x120xf32>, vector<120x128xf32>, vector<5x128xf32> -> vector<5x128xf32>
    %c0_8 = arith.constant 0 : index
    %c0_9 = arith.constant 0 : index
    %43 = vector.load %arg5[%c0_8, %c0_9] : memref<5x1xf32, #tpu.memory_space<vmem>>, vector<5x1xf32>
    %44 = vector.broadcast %43 : vector<5x1xf32> to vector<5x128xf32>
    %45 = arith.addf %42, %44 : vector<5x128xf32>
    %cst_10 = arith.constant dense<0xFF800000> : vector<128xf32>
    %46 = vector.multi_reduction <maximumf>, %45, %cst_10 [0] : vector<5x128xf32> to vector<128xf32>
    %47 = vector.shape_cast %46 : vector<128xf32> to vector<1x128xf32>
    %48 = vector.broadcast %47 : vector<1x128xf32> to vector<5x128xf32>
    %49 = arith.subf %45, %48 : vector<5x128xf32>
    %50 = math.exp %49 : vector<5x128xf32>
    %cst_11 = arith.constant dense<0.000000e+00> : vector<128xf32>
    %51 = vector.multi_reduction <add>, %50, %cst_11 [0] : vector<5x128xf32> to vector<128xf32>
    %52 = vector.shape_cast %51 : vector<128xf32> to vector<1x128xf32>
    %53 = vector.broadcast %52 : vector<1x128xf32> to vector<5x128xf32>
    %54 = arith.divf %50, %53 : vector<5x128xf32>
    %c0_12 = arith.constant 0 : index
    %c0_13 = arith.constant 0 : index
    %55 = vector.load %arg6[%c0_12, %c0_13] : memref<5x128xf32, #tpu.memory_space<vmem>>, vector<5x128xf32>
    tpu.vector_store %arg6[%c0_12, %c0_13], %54 {strides = array<i32>} : memref<5x128xf32, #tpu.memory_space<vmem>>, vector<5x128xf32>,
    return
  }
  func.func @transform_0(%arg0: i32) -> (i32, i32) {
    %c0_i32 = arith.constant 0 : i32
    %c0_i32_0 = arith.constant 0 : i32
    return %c0_i32, %arg0 : i32, i32
  }
  func.func @transform_1(%arg0: i32) -> (i32, i32) {
    %c0_i32 = arith.constant 0 : i32
    %c0_i32_0 = arith.constant 0 : i32
    %c0_i32_1 = arith.constant 0 : i32
    return %c0_i32, %c0_i32_0 : i32, i32
  }
  func.func @transform_2(%arg0: i32) -> (i32, i32) {
    %c0_i32 = arith.constant 0 : i32
    %c0_i32_0 = arith.constant 0 : i32
    %c0_i32_1 = arith.constant 0 : i32
    return %c0_i32, %c0_i32_0 : i32, i32
  }
  func.func @transform_3(%arg0: i32) -> (i32, i32) {
    %c0_i32 = arith.constant 0 : i32
    %c0_i32_0 = arith.constant 0 : i32
    %c0_i32_1 = arith.constant 0 : i32
    return %c0_i32, %c0_i32_0 : i32, i32
  }
  func.func @transform_4(%arg0: i32) -> (i32, i32) {
    %c0_i32 = arith.constant 0 : i32
    %c0_i32_0 = arith.constant 0 : i32
    %c0_i32_1 = arith.constant 0 : i32
    return %c0_i32, %c0_i32_0 : i32, i32
  }
  func.func @transform_5(%arg0: i32) -> (i32, i32) {
    %c0_i32 = arith.constant 0 : i32
    %c0_i32_0 = arith.constant 0 : i32
    return %c0_i32, %arg0 : i32, i32
  }
}

</mosaic_0001>

<bundles_post_ra>
// kernel: tpu_custom_call.1
= control target key start
LH: loop header
LB: loop body
LE: loop exit
PB: predicated region body
PF: predicated region fallthrough
CT: control target
= control target key end

     0   :  { %10 = vsyncpa [#allocation4], 0  ;;  %s1415_s0 = inlined_call_operand.vmem [shape: f32[16,256], index: 0, kind: input, shape index: {}]   ;;  %s1416_s1 = inlined_call_operand.vmem [shape: f32[120,16], index: 1, kind: input, shape index: {}]   ;;  %s1417_s2 = inlined_call_operand.vmem [shape: f32[120,1], index: 2, kind: input, shape index: {}]   ;;  %s1418_s3 = inlined_call_operand.vmem [shape: f32[5,120], index: 3, kind: input, shape index: {}]   ;;  %s1419_s4 = inlined_call_operand.vmem [shape: f32[5,1], index: 4, kind: input, shape index: {}]   ;;  %s1420_s5 = inlined_call_operand.hbm [shape: f32[5,256], index: 5, kind: output, shape index: {}]  }
   0x1   :  { %12 = vsyncpa [#allocation4 + $0x1], 0  ;;  %s1146_s18 = smov 0   ;;  %s1148_s19 = smov 0  }
   0x2   :  { %s1150_s20 = smov 0   ;;  %s1152_s21 = smov 0  }
   0x3 LB: > { %s822_s22 = sadd.s32 4294967295, %s1110_s21   ;;  %s823_s23 = sadd.s32 4294967294, %s1110_s21   ;;  %s1110_s21 = sphi %s1152_s21, %s1428_s21   ;;  %s1106_s20 = sphi %s1150_s20, %s1427_s20   ;;  %s1102_s19 = sphi %s1148_s19, %s1426_s19   ;;  %s1098_s18 = sphi %s1146_s18, %s1425_s18  }
   0x4   : > { %s1169_s24 = sadd.s32 1, %s1110_s21   ;;  %s25_s25 = sadd.s32 1, %s1106_s20 }
   0x5   : > { %s22_s26 = ssub.s32 %s1110_s21, %s1169_s24  ;;  %p32_p0 = scmp.ne.s32.totalorder %s1106_s20, %s1102_s19 }
   0x6   : > { %p23_p1 = scmp.eq.s32.totalorder %s22_s26, 0  ;;  %p33_p2 = scmp.eq.s32.totalorder %s1110_s21, 0 }
   0x7   : > { %p146_p3 = scmp.eq.s32.totalorder %s822_s22, 1  ;;  %p151_p4 = scmp.ne.s32.totalorder %s1102_s19, %s1098_s18 }
   0x8   : > { %s1182_s27 = scalar_select %p23_p1, %s1106_s20, %s25_s25  }
   0x9   : > { %p34_p5 = por %p33_p2, %p32_p0  ;;  %p1184_p6 = por %p146_p3, %p32_p0 }
   0xa   : > { %p152_p7 = scmp.eq.s32.totalorder %s823_s23, 1  ;;  %p1421_p9 = scmp.ge.s32.totalorder %s1110_s21, 2 }
   0xc   : > { %p1188_p8 = por %p152_p7, %p151_p4  ;;  %180 = sbr.rel (%p1421_p9) target bundleno = 22 (0x16), region = 32 }
  0x11   : > { %183 = sbr.rel (!%p34_p5) target bundleno = 22 (0x16), region = 36  ;;  %s185_s30 = sand.u32 (%p34_p5), 1, %s1106_s20  }
  0x12   : > { %s827_s6 = sshll.u32 (%p34_p5), %s1110_s21, 3  ;;  %s826_s7 = sshll.u32 (%p34_p5), %s185_s30, 4 }
  0x13   : > { %s189_s10 = scalar_lea.vmem (%p34_p5), %s1415_s0, %s827_s6  ;;  %s187_s11 = scalar_lea.vmem (%p34_p5), [#allocation2], %s826_s7 }
  0x14   : > { %v220_v0 = vld [vmem:[%s189_s10] sm:$0xff] (%p34_p5)  ;;  %v222_v1 = vld [vmem:[%s189_s10 + $0x10] sm:$0xff] (%p34_p5) }
  0x15   : > { %221 = vst [vmem:[%s187_s11] sm:$0xff] (%p34_p5), %v220_v0  ;;  %223 = vst [vmem:[%s187_s11 + $0x8] sm:$0xff] (%p34_p5), %v222_v1 }
  0x16 PF: > { %p828_p10 = scmp.ge.s32.totalorder %s1110_s21, 1  ;;  %p228_p11 = scmp.lt.s32.totalorder %s1110_s21, 3 }
  0x18   : > { %p229_p12 = pnand %p828_p10, %p228_p11 }
  0x19   : > { %s1203_s12 = sand.u32 (!%p229_p12), 1, %s1102_s19   ;;  %s848_s26 = sshll.u32 (!%p229_p12), %s822_s22, 7 }
  0x1a   : > { %232 = sbr.rel (%p229_p12) target bundleno = 632 (0x278), region = 74  ;;  %s829_s13 = sshll.u32 (!%p229_p12), %s1203_s12, 4 }
  0x1b   : > { %s237_s14 = scalar_lea.vmem (!%p229_p12), [#allocation2], %s829_s13  ;;  %s830_s25 = sshll.u32 (!%p229_p12), %s1203_s12, 3 }
  0x1c   : > { %s261_s30 = scalar_lea.vmem (!%p229_p12), [#allocation3], %s830_s25  ;;  %s756_s9 = scalar_lea.hbm (!%p229_p12), %s1420_s5, %s848_s26 }
  0x1d   : > { %s758_s6 = sshll.u32 (!%p229_p12), %s261_s30, 4  ;;  %s745_s10 = scalar_lea.sflag (!%p229_p12), [#allocation4], %s1203_s12  ;;  %s759_s6 = int_to_ptr.vmem [resolvable:$true] %s758_s6 }
  0x1e   : > { %s1050_s11 = scalar_lea.vmem (!%p229_p12), %s759_s6, 128  ;;  %s1115_s13 = smov (!%p229_p12), [#allocation3]  }
  0x1f   : > { %v1112_v2 = vmov 0.0   ;;  %vm1113_vm0 = vmmov 0   ;;  %v1114_v3 = vmov 0   ;;  %v263_v4 = vld [vmem:[%s237_s14 + $0x8] sm:$0xff]  ;;  %v262_v5 = vld [vmem:[%s237_s14] sm:$0xff]  ;;  %vm369_vm1 = vcmask 130048   ;;  %p1051_p13 = scmp.ne.s32.totalorder %s759_s6, %s1050_s11 }
  0x20   : > { %884 = vmatprep.subr.mxu0 %v1112_v2  ;;  %888 = vmatprep.mubr.msk.f32.mxu0 %vm1113_vm0, %v1112_v2  ;;  %v264_v6 = vld [vmem:[%s1416_s1] sm:$0xff]  ;;  %v280_v7 = vld [vmem:[%s1417_s2 + $0x8] sm:$0xff]  ;;  %v281_v8 = vld [vmem:[%s1417_s2 + $0x10] sm:$0xff]  ;;  %vm649_vm2 = vcmask 982016   ;;  %vm723_vm3 = vcmask 1044480   ;;  %s1054_s14 = sshll.u32 %s1115_s13, 4  ;;  %s1055_s14 = int_to_ptr.vmem [resolvable:$false] %s1054_s14 }
  0x21   : > { %1009 = vset.pattern.permute.xlu1 %v1114_v3  ;;  %1008 = vset.pattern.permute.xlu0 %v1114_v3  ;;  %v265_v9 = vld [vmem:[%s1416_s1 + $0x8] sm:$0xff]  ;;  %v283_v10 = vld [vmem:[%s1417_s2 + $0x20] sm:$0xff]  ;;  %v266_v12 = vld [vmem:[%s1416_s1 + $0x10] sm:$0xff]  ;;  %p1052_p0 = pnand %p1051_p13, %p1184_p6  ;;  %s1056_s22 = scalar_lea.vmem %s1055_s14, 256 }
  0x22   : > { %933 = vmatprep.subr.mxu1 %v1112_v2  ;;  %963 = vmatprep.mubr.msk.f32.mxu1 %vm1113_vm0, %v1112_v2  ;;  %v284_v11 = vld [vmem:[%s1417_s2 + $0x28] sm:$0xff]  ;;  %v279_v13 = vld [vmem:[%s1417_s2] sm:$0xff]  ;;  %v267_v15 = vld [vmem:[%s1416_s1 + $0x18] sm:$0xff]  ;;  %p1057_p2 = scmp.lt.s32.totalorder %s759_s6, %s1055_s14  ;;  %p1058_p3 = scmp.lt.s32.totalorder %s1056_s22, %s1050_s11 }
  0x23   : > { %885 = vmatpush3.msra.mxu0 %v263_v4  ;;  %301 = vperm.xlu1 %1009, %v280_v7   ;;  %v287_v14 = vld [vmem:[%s1417_s2 + $0x40] sm:$0xff]  ;;  %v286_v16 = vld [vmem:[%s1417_s2 + $0x38] sm:$0xff]  ;;  %v285_v19 = vld [vmem:[%s1417_s2 + $0x30] sm:$0xff]  ;;  %p1053_p1 = pneg %p1052_p0 }
  0x24   : > { %886 = vmatprep.subr.mxu0 %v1112_v2  ;;  %306 = vperm.xlu0 %1008, %v281_v8   ;;  %v282_v17 = vld [vmem:[%s1417_s2 + $0x18] sm:$0xff]  ;;  %v268_v18 = vld [vmem:[%s1416_s1 + $0x20] sm:$0xff]  ;;  %v269_v21 = vld [vmem:[%s1416_s1 + $0x28] sm:$0xff]  ;;  %p1059_p4 = por %p1058_p3, %p1057_p2 }
  0x25   : > { %887 = vmatpush3.msra.mxu0 %v262_v5  ;;  %v290_v20 = vld [vmem:[%s1417_s2 + $0x58] sm:$0xff]  ;;  %v293_v22 = vld [vmem:[%s1417_s2 + $0x70] sm:$0xff]  ;;  %v292_v25 = vld [vmem:[%s1417_s2 + $0x68] sm:$0xff] }
  0x26   : > { %889 = vmatmul.mubr.msk.f32.vlgmr.msra.gmra.mxu0 %vm369_vm1, %v264_v6  ;;  %v289_v23 = vld [vmem:[%s1417_s2 + $0x50] sm:$0xff]  ;;  %v288_v26 = vld [vmem:[%s1417_s2 + $0x48] sm:$0xff]  ;;  %v271_v27 = vld [vmem:[%s1416_s1 + $0x38] sm:$0xff]  ;;  %p1060_p5 = pnand %p1059_p4, %p1053_p1 }
  0x27   : > { %891 = vmatprep.mubr.msk.f32.mxu0 %vm1113_vm0, %v1112_v2  ;;  %316 = vperm.xlu1 %1009, %v283_v10   ;;  %v270_v24 = vld [vmem:[%s1416_s1 + $0x30] sm:$0xff]  ;;  %v643_v28 = vld [vmem:[%s1419_s4] sm:$0x1f]  ;;  %v273_v31 = vld [vmem:[%s1416_s1 + $0x48] sm:$0xff] }
  0x28   : > { %321 = vperm.xlu0 %1008, %v284_v11   ;;  %v291_v29 = vld [vmem:[%s1417_s2 + $0x60] sm:$0xff]  ;;  %v274_v32 = vld [vmem:[%s1416_s1 + $0x50] sm:$0xff]  ;;  %v275_v33 = vld [vmem:[%s1416_s1 + $0x58] sm:$0xff] }
  0x29   : > { %v272_v30 = vld [vmem:[%s1416_s1 + $0x40] sm:$0xff]  ;;  %v277_v35 = vld [vmem:[%s1416_s1 + $0x68] sm:$0xff]  ;;  %v278_v36 = vld [vmem:[%s1416_s1 + $0x70] sm:$0xff] }
  0x2a   : > { %892 = vmatmul.mubr.msk.f32.gmra.mxu0 %vm369_vm1, %v265_v9  ;;  %v276_v34 = vld [vmem:[%s1416_s1 + $0x60] sm:$0xff] }
  0x2b   : > { %894 = vmatprep.mubr.msk.f32.mxu0 %vm1113_vm0, %v1112_v2  ;;  %296 = vperm.xlu1 %1009, %v279_v13  }
  0x2c   : > { %336 = vperm.xlu0 %1008, %v287_v14  }
  0x2e   : > { %895 = vmatmul.mubr.msk.f32.gmra.mxu0 %vm369_vm1, %v266_v12 }
  0x2f   : > { %897 = vmatprep.mubr.msk.f32.mxu0 %vm1113_vm0, %v1112_v2  ;;  %331 = vperm.xlu1 %1009, %v286_v16  }
  0x30   : > { %311 = vperm.xlu0 %1008, %v282_v17  }
  0x32   : > { %898 = vmatmul.mubr.msk.f32.gmra.mxu0 %vm369_vm1, %v267_v15 }
  0x33   : > { %900 = vmatprep.mubr.msk.f32.mxu0 %vm1113_vm0, %v1112_v2  ;;  %326 = vperm.xlu1 %1009, %v285_v19  }
  0x34   : > { %351 = vperm.xlu0 %1008, %v290_v20  }
  0x36   : > { %901 = vmatmul.mubr.msk.f32.gmra.mxu0 %vm369_vm1, %v268_v18 }
  0x37   : > { %903 = vmatprep.mubr.msk.f32.mxu0 %vm1113_vm0, %v1112_v2  ;;  %366 = vperm.xlu1 %1009, %v293_v22  }
  0x38   : > { %346 = vperm.xlu0 %1008, %v289_v23  }
  0x3a   : > { %904 = vmatmul.mubr.msk.f32.gmra.mxu0 %vm369_vm1, %v269_v21 }
  0x3b   : > { %906 = vmatprep.mubr.msk.f32.mxu0 %vm1113_vm0, %v1112_v2  ;;  %361 = vperm.xlu1 %1009, %v292_v25  }
  0x3c   : > { %341 = vperm.xlu0 %1008, %v288_v26  }
  0x3e   : > { %907 = vmatmul.mubr.msk.f32.gmra.mxu0 %vm369_vm1, %v270_v24 }
  0x3f   : > { %909 = vmatprep.mubr.msk.f32.mxu0 %vm1113_vm0, %v1112_v2  ;;  %646 = vperm.xlu1 %1009, %v643_v28  }
  0x40   : > { %356 = vperm.xlu0 %1008, %v291_v29  }
  0x42   : > { %910 = vmatmul.mubr.msk.f32.gmra.mxu0 %vm369_vm1, %v271_v27 }
  0x43   : > { %912 = vmatprep.mubr.msk.f32.mxu0 %vm1113_vm0, %v1112_v2 }
  0x46   : > { %913 = vmatmul.mubr.msk.f32.gmra.mxu0 %vm369_vm1, %v272_v30 }
  0x47   : > { %915 = vmatprep.mubr.msk.f32.mxu0 %vm1113_vm0, %v1112_v2 }
  0x4a   : > { %916 = vmatmul.mubr.msk.f32.gmra.mxu0 %vm369_vm1, %v273_v31 }
  0x4b   : > { %918 = vmatprep.mubr.msk.f32.mxu0 %vm1113_vm0, %v1112_v2 }
  0x4e   : > { %919 = vmatmul.mubr.msk.f32.gmra.mxu0 %vm369_vm1, %v274_v32 }
  0x4f   : > { %921 = vmatprep.mubr.msk.f32.mxu0 %vm1113_vm0, %v1112_v2 }
  0x52   : > { %922 = vmatmul.mubr.msk.f32.gmra.mxu0 %vm369_vm1, %v275_v33 }
  0x53   : > { %924 = vmatprep.mubr.msk.f32.mxu0 %vm1113_vm0, %v1112_v2 }
  0x56   : > { %925 = vmatmul.mubr.msk.f32.gmra.mxu0 %vm369_vm1, %v276_v34 }
  0x57   : > { %927 = vmatprep.mubr.msk.f32.mxu0 %vm1113_vm0, %v1112_v2 }
  0x5a   : > { %928 = vmatmul.mubr.msk.f32.gmra.mxu0 %vm369_vm1, %v277_v35 }
  0x5b   : > { %930 = vmatprep.mubr.msk.f32.mxu0 %vm1113_vm0, %v1112_v2 }
  0x5e   : > { %931 = vmatmul.mubr.msk.f32.gmra.mxu0 %vm369_vm1, %v278_v36 }
  0x9e   : > { %v302_v49 = vpop.permute.xlu1 %301 }
  0x9f   : > { %v307_v41 = vpop.permute.xlu0 %306 }
  0xa2   : > { %v317_v54 = vpop.permute.xlu1 %316 }
  0xa3   : > { %v322_v45 = vpop.permute.xlu0 %321 }
  0xa6   : > { %v297_v60 = vpop.permute.xlu1 %296 }
  0xa7   : > { %v337_v50 = vpop.permute.xlu0 %336 }
  0xaa   : > { %v332_v63 = vpop.permute.xlu1 %331 }
  0xab   : > { %v312_v55 = vpop.permute.xlu0 %311 }
  0xae   : > { %v327_v6 = vpop.permute.xlu1 %326 }
  0xaf   : > { %v352_v58 = vpop.permute.xlu0 %351 }
  0xb2   : > { %v367_v17 = vpop.permute.xlu1 %366 }
  0xb3   : > { %v347_v0 = vpop.permute.xlu0 %346 }
  0xb6   : > { %v362_v34 = vpop.permute.xlu1 %361 }
  0xb7   : > { %v342_v7 = vpop.permute.xlu0 %341 }
  0xbb   : > { %v357_v20 = vpop.permute.xlu0 %356 }
  0xe6   : > { %v481_v37 = vpop.f32.mrf.mxu0 }
  0xe7   : > { %v482_v9 = vadd.f32 %v481_v37, %v297_v60 }
  0xe8   : > { %v890_v38 = vpop.f32.mrf.mxu0 }
  0xea   : > { %v486_v39 = vpop.f32.mrf.mxu0 }
  0xeb   : > { %v487_v18 = vadd.f32 %v486_v39, %v302_v49 }
  0xec   : > { %v893_v40 = vpop.f32.mrf.mxu0 }
  0xee   : > { %v491_v42 = vpop.f32.mrf.mxu0 }
  0xef   : > { %v492_v28 = vadd.f32 %v491_v42, %v307_v41 }
  0xf0   : > { %v896_v43 = vpop.f32.mrf.mxu0 }
  0xf2   : > { %v496_v44 = vpop.f32.mrf.mxu0 }
  0xf3   : > { %v497_v5 = vadd.f32 %v496_v44, %v312_v55 }
  0xf4   : > { %v899_v46 = vpop.f32.mrf.mxu0 }
  0xf5   : > { %v555_v12 = vmax.f32 %v482_v9, %v497_v5 }
  0xf6   : > { %v501_v47 = vpop.f32.mrf.mxu0 }
  0xf7   : > { %v502_v14 = vadd.f32 %v501_v47, %v317_v54 }
  0xf8   : > { %v902_v48 = vpop.f32.mrf.mxu0 }
  0xf9   : > { %v556_v25 = vmax.f32 %v487_v18, %v502_v14 }
  0xfa   : > { %v506_v51 = vpop.f32.mrf.mxu0 }
  0xfb   : > { %v507_v22 = vadd.f32 %v506_v51, %v322_v45 }
  0xfc   : > { %v905_v52 = vpop.f32.mrf.mxu0 }
  0xfd   : > { %v557_v33 = vmax.f32 %v492_v28, %v507_v22 }
  0xfe   : > { %v511_v53 = vpop.f32.mrf.mxu0 }
  0xff   : > { %v512_v10 = vadd.f32 %v511_v53, %v327_v6 }
 0x100   : > { %v908_v56 = vpop.f32.mrf.mxu0 }
 0x101   : > { %v558_v16 = vmax.f32 %v555_v12, %v512_v10 }
 0x102   : > { %v516_v57 = vpop.f32.mrf.mxu0 }
 0x103   : > { %v517_v19 = vadd.f32 %v516_v57, %v332_v63 }
 0x104   : > { %v911_v59 = vpop.f32.mrf.mxu0 }
 0x105   : > { %v559_v31 = vmax.f32 %v556_v25, %v517_v19 }
 0x106   : > { %v521_v61 = vpop.f32.mrf.mxu0 }
 0x107   : > { %v522_v29 = vadd.f32 %v521_v61, %v337_v50 }
 0x108   : > { %v914_v62 = vpop.f32.mrf.mxu0 }
 0x109   : > { %v560_v43 = vmax.f32 %v557_v33, %v522_v29 }
 0x10a   : > { %v526_v1 = vpop.f32.mrf.mxu0 }
 0x10b   : > { %v527_v13 = vadd.f32 %v526_v1, %v342_v7 }
 0x10c   : > { %v917_v3 = vpop.f32.mrf.mxu0 }
 0x10d   : > { %v561_v23 = vmax.f32 %v558_v16, %v527_v13 }
 0x10e   : > { %v531_v4 = vpop.f32.mrf.mxu0 }
 0x10f   : > { %v532_v26 = vadd.f32 %v531_v4, %v347_v0 }
 0x110   : > { %v920_v8 = vpop.f32.mrf.mxu0 }
 0x111   : > { %v562_v38 = vmax.f32 %v559_v31, %v532_v26 }
 0x112   : > { %v536_v11 = vpop.f32.mrf.mxu0 }
 0x113   : > { %v537_v35 = vadd.f32 %v536_v11, %v352_v58 }
 0x114   : > { %v923_v15 = vpop.f32.mrf.mxu0 }
 0x115   : > { %v563_v49 = vmax.f32 %v560_v43, %v537_v35 }
 0x116   : > { %v541_v21 = vpop.f32.mrf.mxu0 }
 0x117   : > { %v542_v24 = vadd.f32 %v541_v21, %v357_v20 }
 0x118   : > { %v926_v27 = vpop.f32.mrf.mxu0 }
 0x119   : > { %v564_v30 = vmax.f32 %v561_v23, %v542_v24 }
 0x11a   : > { %v546_v32 = vpop.f32.mrf.mxu0 }
 0x11b   : > { %v567_v36 = vsub.f32 %v482_v9, %v564_v30  ;;  %v576_v37 = vsub.f32 %v497_v5, %v564_v30  ;;  %v547_v39 = vadd.f32 %v546_v32, %v362_v34  ;;  %v585_v46 = vsub.f32 %v512_v10, %v564_v30 }
 0x11c   : > { %v929_v40 = vpop.f32.mrf.mxu0  ;;  %v594_v58 = vsub.f32 %v527_v13, %v564_v30  ;;  %v603_v6 = vsub.f32 %v542_v24, %v564_v30 }
 0x11d   : > { %v570_v44 = vmul.f32 1.442695, %v567_v36  ;;  %v579_v45 = vmul.f32 1.442695, %v576_v37  ;;  %v565_v47 = vmax.f32 %v562_v38, %v547_v39  ;;  %v588_v55 = vmul.f32 1.442695, %v585_v46 }
 0x11e   : > { %v551_v48 = vpop.f32.mrf.mxu0  ;;  %v597_v5 = vmul.f32 1.442695, %v594_v58  ;;  %v606_v11 = vmul.f32 1.442695, %v603_v6  ;;  %v642_v58 = vld [vmem:[%s1418_s3] sm:$0x1f] }
 0x11f   : > { %v552_v41 = vadd.f32 %v551_v48, %v367_v17  ;;  %v568_v42 = vsub.f32 %v487_v18, %v565_v47  ;;  %v577_v50 = vsub.f32 %v502_v14, %v565_v47  ;;  %v586_v51 = vsub.f32 %v517_v19, %v565_v47 }
 0x120   : > { %v932_v52 = vpop.f32.mrf.mxu0  ;;  %1010 = vpow2.f32 %v570_v44  ;;  %v595_v53 = vsub.f32 %v532_v26, %v565_v47  ;;  %v604_v0 = vsub.f32 %v547_v39, %v565_v47 }
 0x121   : > { %v566_v54 = vmax.f32 %v563_v49, %v552_v41  ;;  %1012 = vpow2.f32 %v579_v45  ;;  %v572_v56 = vmul.f32 1.442695, %v568_v42  ;;  %v581_v57 = vmul.f32 1.442695, %v577_v50 }
 0x122   : > { %v590_v59 = vmul.f32 1.442695, %v586_v51  ;;  %v599_v61 = vmul.f32 1.442695, %v595_v53  ;;  %v608_v9 = vmul.f32 1.442695, %v604_v0 }
 0x123   : > { %v569_v60 = vsub.f32 %v492_v28, %v566_v54  ;;  %1014 = vpow2.f32 %v572_v56  ;;  %v578_v62 = vsub.f32 %v507_v22, %v566_v54  ;;  %v587_v63 = vsub.f32 %v522_v29, %v566_v54 }
 0x124   : > { %1016 = vpow2.f32 %v581_v57  ;;  %v596_v4 = vsub.f32 %v537_v35, %v566_v54  ;;  %v605_v8 = vsub.f32 %v552_v41, %v566_v54 }
 0x125   : > { %v574_v1 = vmul.f32 1.442695, %v569_v60  ;;  %1018 = vpow2.f32 %v588_v55  ;;  %v583_v3 = vmul.f32 1.442695, %v578_v62  ;;  %v592_v7 = vmul.f32 1.442695, %v587_v63 }
 0x126   : > { %1020 = vpow2.f32 %v590_v59  ;;  %v601_v10 = vmul.f32 1.442695, %v596_v4  ;;  %v610_v12 = vmul.f32 1.442695, %v605_v8  ;;  %v647_v59 = vpop.permute.xlu1 %646 }
 0x127   : > { %1022 = vpow2.f32 %v599_v61 }
 0x128   : > { %1024 = vpow2.f32 %v574_v1 }
 0x129   : > { %1026 = vpow2.f32 %v583_v3 }
 0x12a   : > { %1028 = vpow2.f32 %v597_v5 }
 0x12b   : > { %1030 = vpow2.f32 %v592_v7 }
 0x12c   : > { %1032 = vpow2.f32 %v608_v9 }
 0x12d   : > { %v1349_v13 = vpop.eup %1010  ;;  %1034 = vpow2.f32 %v601_v10 }
 0x12e   : > { %v1351_v14 = vpop.eup %1012  ;;  %1036 = vpow2.f32 %v606_v11 }
 0x12f   : > { %1038 = vpow2.f32 %v610_v12  ;;  %v612_v17 = vadd.f32 %v1351_v14, %v1349_v13 }
 0x130   : > { %v1353_v15 = vpop.eup %1014 }
 0x131   : > { %v1017_v16 = vpop.eup %1016 }
 0x132   : > { %v1019_v18 = vpop.eup %1018  ;;  %v613_v19 = vadd.f32 %v1017_v16, %v1353_v15 }
 0x133   : > { %v1021_v20 = vpop.eup %1020  ;;  %v615_v24 = vadd.f32 %v1019_v18, %v612_v17 }
 0x134   : > { %v1023_v21 = vpop.eup %1022  ;;  %v616_v22 = vadd.f32 %v1021_v20, %v613_v19 }
 0x135   : > { %v1025_v23 = vpop.eup %1024 }
 0x136   : > { %v1027_v25 = vpop.eup %1026  ;;  %v619_v26 = vadd.f32 %v1023_v21, %v616_v22 }
 0x137   : > { %v1029_v27 = vpop.eup %1028  ;;  %v614_v28 = vadd.f32 %v1027_v25, %v1025_v23 }
 0x138   : > { %v1031_v29 = vpop.eup %1030  ;;  %v618_v31 = vadd.f32 %v1029_v27, %v615_v24 }
 0x139   : > { %v1033_v30 = vpop.eup %1032  ;;  %v617_v32 = vadd.f32 %v1031_v29, %v614_v28 }
 0x13a   : > { %v1035_v33 = vpop.eup %1034  ;;  %v622_v34 = vadd.f32 %v1033_v30, %v619_v26 }
 0x13b   : > { %v1037_v35 = vpop.eup %1036  ;;  %v620_v36 = vadd.f32 %v1035_v33, %v617_v32 }
 0x13c   : > { %v1039_v37 = vpop.eup %1038  ;;  %v621_v38 = vadd.f32 %v1037_v35, %v618_v31  ;;  %1040 = vrcp.f32 %v622_v34 }
 0x13d   : > { %v623_v39 = vadd.f32 %v1039_v37, %v620_v36 }
 0x13f   : > { %1042 = vrcp.f32 %v623_v39 }
 0x140   : > { %1044 = vrcp.f32 %v621_v38 }
 0x149   : > { %v1041_v40 = vpop.eup %1040 }
 0x14a   : > { %v640_v46 = vmul.f32 %v1041_v40, %v1033_v30  ;;  %v637_v49 = vmul.f32 %v1041_v40, %v1023_v21  ;;  %v634_v50 = vmul.f32 %v1041_v40, %v1021_v20  ;;  %v631_v53 = vmul.f32 %v1041_v40, %v1017_v16 }
 0x14b   : > { %v628_v56 = vmul.f32 %v1041_v40, %v1353_v15 }
 0x14c   : > { %v1043_v43 = vpop.eup %1042 }
 0x14d   : > { %v641_v44 = vmul.f32 %v1043_v43, %v1039_v37  ;;  %v1045_v45 = vpop.eup %1044  ;;  %v638_v48 = vmul.f32 %v1043_v43, %v1035_v33  ;;  %v635_v42 = vmul.f32 %v1043_v43, %v1031_v29  ;;  %v632_v52 = vmul.f32 %v1043_v43, %v1027_v25 }
 0x14e   : > { %v639_v47 = vmul.f32 %v1045_v45, %v1037_v35  ;;  %v636_v41 = vmul.f32 %v1045_v45, %v1029_v27  ;;  %v633_v51 = vmul.f32 %v1045_v45, %v1019_v18  ;;  %v630_v54 = vmul.f32 %v1045_v45, %v1351_v14 }
 0x14f   : > { %934 = vmatpush3.msra.mxu1 %v641_v44  ;;  %v629_v55 = vmul.f32 %v1043_v43, %v1025_v23  ;;  %v627_v57 = vmul.f32 %v1045_v45, %v1349_v13 }
 0x150   : > { %935 = vmatprep.subr.mxu1 %v1112_v2 }
 0x151   : > { %936 = vmatpush3.msra.mxu1 %v640_v46 }
 0x152   : > { %937 = vmatprep.subr.mxu1 %v1112_v2 }
 0x153   : > { %938 = vmatpush3.msra.mxu1 %v639_v47 }
 0x154   : > { %939 = vmatprep.subr.mxu1 %v1112_v2 }
 0x155   : > { %940 = vmatpush3.msra.mxu1 %v638_v48 }
 0x156   : > { %941 = vmatprep.subr.mxu1 %v1112_v2 }
 0x157   : > { %942 = vmatpush3.msra.mxu1 %v637_v49 }
 0x158   : > { %943 = vmatprep.subr.mxu1 %v1112_v2 }
 0x159   : > { %944 = vmatpush3.msra.mxu1 %v636_v41 }
 0x15a   : > { %945 = vmatprep.subr.mxu1 %v1112_v2 }
 0x15b   : > { %946 = vmatpush3.msra.mxu1 %v635_v42 }
 0x15c   : > { %947 = vmatprep.subr.mxu1 %v1112_v2 }
 0x15d   : > { %948 = vmatpush3.msra.mxu1 %v634_v50 }
 0x15e   : > { %949 = vmatprep.subr.mxu1 %v1112_v2 }
 0x15f   : > { %950 = vmatpush3.msra.mxu1 %v633_v51 }
 0x160   : > { %951 = vmatprep.subr.mxu1 %v1112_v2 }
 0x161   : > { %952 = vmatpush3.msra.mxu1 %v632_v52 }
 0x162   : > { %953 = vmatprep.subr.mxu1 %v1112_v2 }
 0x163   : > { %954 = vmatpush3.msra.mxu1 %v631_v53 }
 0x164   : > { %955 = vmatprep.subr.mxu1 %v1112_v2 }
 0x165   : > { %956 = vmatpush3.msra.mxu1 %v630_v54 }
 0x166   : > { %957 = vmatprep.subr.mxu1 %v1112_v2 }
 0x167   : > { %958 = vmatpush3.msra.mxu1 %v629_v55 }
 0x168   : > { %959 = vmatprep.subr.mxu1 %v1112_v2 }
 0x169   : > { %960 = vmatpush3.msra.mxu1 %v628_v56 }
 0x16a   : > { %961 = vmatprep.subr.mxu1 %v1112_v2 }
 0x16b   : > { %962 = vmatpush3.msra.mxu1 %v627_v57 }
 0x16c   : > { %964 = vmatmul.mubr.msk.f32.vlgmr.msra.gmra.mxu1 %vm649_vm2, %v642_v58 }
 0x22c   : > { %v719_v60 = vpop.f32.mrf.mxu1 }
 0x22d   : > { %v720_v61 = vadd.f32 %v719_v60, %v647_v59 }
 0x22e   : > { %v965_v62 = vpop.f32.mrf.mxu1 }
 0x22f   : > { %v724_v63 = vsel %vm723_vm3, %v720_v61, -inf }
 0x230   : > { %v725_v0 = vrot.slane %v724_v63, 4 }
 0x232   : > { %v726_v1 = vmax.f32 %v724_v63, %v725_v0 }
 0x234   : > { %v727_v3 = vrot.slane %v726_v1, 2 }
 0x236   : > { %v728_v4 = vmax.f32 %v726_v1, %v727_v3 }
 0x238   : > { %v729_v5 = vrot.slane %v728_v4, 1 }
 0x23a   : > { %v730_v6 = vmax.f32 %v728_v4, %v729_v5 }
 0x23c   : > { %v731_v7 = vsub.f32 %v720_v61, %v730_v6 }
 0x23e   : > { %v732_v8 = vmul.f32 1.442695, %v731_v7 }
 0x240   : > { %1046 = vpow2.f32 %v732_v8 }
 0x24d   : > { %v1047_v2 = vpop.eup %1046 }
 0x24e   : > { %v734_v9 = vsel %vm723_vm3, %v1047_v2, 0.0 }
 0x24f   : > { %v735_v10 = vrot.slane %v734_v9, 4 }
 0x251   : > { %v736_v11 = vadd.f32 %v735_v10, %v734_v9 }
 0x253   : > { %v737_v12 = vrot.slane %v736_v11, 2 }
 0x255   : > { %v738_v13 = vadd.f32 %v737_v12, %v736_v11 }
 0x257   : > { %v739_v14 = vrot.slane %v738_v13, 1 }
 0x259   : > { %v740_v15 = vadd.f32 %v739_v14, %v738_v13 }
 0x25b   : > { %1048 = vrcp.f32 %v740_v15 }
 0x268   : > { %v1049_v16 = vpop.eup %1048 }
 0x269   : > { %v742_v17 = vmul.f32 %v1049_v16, %v1047_v2 }
 0x26b   : > { %743 = vst [vmem:[%s261_s30] sm:$0x1f] %v742_v17 }
 0x26c   : > { %1063 = shalt.err (!%p1060_p5)
}
 0x26d   : > { %s1064_s15 = scalar_lea.hbm %s756_s9, 128  ;;  %s1068_s17 = scalar_lea.hbm %s1420_s5, 256 }
 0x26e   : > { %p1065_p7 = scmp.ne.s32.totalorder %s756_s9, %s1064_s15  ;;  %p1069_p12 = scmp.lt.s32.totalorder %s756_s9, %s1420_s5 }
 0x26f   : > { %p1070_p13 = scmp.lt.s32.totalorder %s1068_s17, %s1064_s15 }
 0x270   : > { %p1066_p10 = pnand %p1065_p7, %p1184_p6 }
 0x271   : > { %p1071_p0 = por %p1070_p13, %p1069_p12 }
 0x272   : > { %p1067_p11 = pneg %p1066_p10 }
 0x274   : > { %p1072_p9 = pnand %p1071_p0, %p1067_p11 }
 0x276   : > { %1075 = shalt.err (!%p1072_p9)
}
 0x277   : > { %966 = dma.vmem_to_hbm [thread:$0]  (%p1184_p6), %s759_s6, 128, %s756_s9, %s745_s10  }
 0x278 PF: > { %s770_s26 = sand.u32 1, %s1098_s18   ;;  %p1424_p1 = scmp.ge.s32.totalorder %s1110_s21, 2 }
 0x279   : > { %s771_s30 = scalar_lea.sflag [#allocation4], %s770_s26 }
 0x27a   : > { %p969_p2 = pnand %p1424_p1, %p1188_p8 }
 0x27c   : > { %p970_p3 = pneg %p969_p2 }
 0x27e   : > { %1093 = dma.done.wait (%p970_p3), %s771_s30, 128  }
 0x27f   : > { %1095 = vsyncadd (%p970_p3), %s771_s30, 4294967168  ;;  %p15_p9 = scmp.ge.s32.totalorder %s1169_s24, 4   ;;  %s1425_s18 = smov %s1102_s19 }
 0x280   : > { %s1426_s19 = smov %s1106_s20  ;;  %s1427_s20 = smov %s1182_s27 }
 0x281   : > { %s1428_s21 = smov %s1169_s24  ;;  %17 = sbr.rel (!%p15_p9) target bundleno = 3 (0x3), region = 118 }
 0x286   :  { %776 = vsyncpa [#allocation4], 1 }
 0x287   :  { %778 = vsyncpa [#allocation4 + $0x1], 1 }

</bundles_post_ra>
